<compile_context>
chip_gen: v5e
topology: v5e:2x2
jax: 0.10.0
libtpu: 0.0.40
codegen_flags: <defaults>
</compile_context>

<pallas_src>
import jax
import jax.numpy as jnp
from jax.experimental import pallas as pl
from jax.experimental.pallas import tpu as pltpu

K_IN = 28 * 28          # 784 (contraction dim, passed un-padded)
H = 128                 # hidden width (already lane-aligned)
N_OUT = 10              # logits
N_PAD = 128             # lane-dense padded output width
MAX_TILE_B = 256        # batch tile (rows per grid step)


def _round_up(x, m):
    return (x + m - 1) // m * m


def mlp_kernel(x_ref, w1_ref, b1_ref, w2_ref, b2_ref, o_ref):
    # x arrives f32; cast to bf16 on the VPU so the MXU runs its fast path.
    xb = x_ref[...].astype(jnp.bfloat16)                      # [TILE_B, 784]
    h = jnp.dot(xb, w1_ref[...],
                preferred_element_type=jnp.float32)            # [TILE_B, 128] f32 acc
    h = jnp.maximum(h + b1_ref[...], 0.0)                      # f32 bias + ReLU (VPU)
    o = jnp.dot(h.astype(w2_ref.dtype), w2_ref[...],
                preferred_element_type=jnp.float32)            # [TILE_B, 128]
    o_ref[...] = (o + b2_ref[...]).astype(o_ref.dtype)         # lane-dense full vst


@jax.jit
def simple_mnist_forward(x_nchw, w1, b1, w2, b2):
    """x_nchw: [B, 1, 28, 28] float32 -> logits [B, 10] float32."""
    B = x_nchw.shape[0]
    x_flat = x_nchw.reshape(B, K_IN)                           # torch.nn.Flatten on NCHW

    # ---- batch tiling (sublane-aligned; pad only the batch dim, stays f32) ----
    b8 = _round_up(B, 8)
    tile_b = min(MAX_TILE_B, b8)
    b_pad = _round_up(B, tile_b)
    grid_b = b_pad // tile_b
    x_p = jnp.pad(x_flat, ((0, b_pad - B), (0, 0)))            # no-op copy when aligned

    # ---- small resident operands: cast weights to bf16, pad N 10 -> 128 ----
    w1_c = w1.astype(jnp.bfloat16)                             # [784, 128]
    b1_c = b1.reshape(1, H).astype(jnp.float32)                # [1, 128]
    w2_c = jnp.pad(w2.astype(jnp.bfloat16),
                   ((0, 0), (0, N_PAD - N_OUT)))               # [128, 128]
    b2_c = jnp.pad(b2.astype(jnp.float32),
                   (0, N_PAD - N_OUT)).reshape(1, N_PAD)       # [1, 128]

    cost = pl.CostEstimate(
        flops=2 * b_pad * (K_IN * H + H * N_PAD),
        transcendentals=0,
        bytes_accessed=(b_pad * K_IN * 4                       # x stream (f32)
                        + K_IN * H * 2                         # W1 (bf16)
                        + H * N_PAD * 2                        # W2 (bf16)
                        + (H + N_PAD) * 4                      # biases (f32)
                        + b_pad * N_PAD * 4),                  # output (f32)
    )

    out = pl.pallas_call(
        mlp_kernel,
        out_shape=jax.ShapeDtypeStruct((b_pad, N_PAD), jnp.float32),
        grid=(grid_b,),
        in_specs=[
            pl.BlockSpec((tile_b, K_IN), lambda i: (i, 0)),    # x: tiled over batch
            pl.BlockSpec((K_IN, H), lambda i: (0, 0)),         # W1: resident
            pl.BlockSpec((1, H), lambda i: (0, 0)),            # b1: resident
            pl.BlockSpec((H, N_PAD), lambda i: (0, 0)),        # W2: resident
            pl.BlockSpec((1, N_PAD), lambda i: (0, 0)),        # b2: resident
        ],
        out_specs=pl.BlockSpec((tile_b, N_PAD), lambda i: (i, 0)),
        compiler_params=pltpu.CompilerParams(
            dimension_semantics=("parallel",)),                # shard batch tiles over TCs
        cost_estimate=cost,
    )(x_p, w1_c, b1_c, w2_c, b2_c)

    return out[:B, :N_OUT]                                     # drop batch/N padding


def init_params(key):
    """Deterministic init matching torch.nn.Linear shapes (stored as (in, out))."""
    k1, k2, k3, k4 = jax.random.split(key, 4)
    lim1 = 1.0 / jnp.sqrt(784.0)
    lim2 = 1.0 / jnp.sqrt(128.0)
    w1 = jax.random.uniform(k1, (K_IN, H), jnp.float32, -lim1, lim1)
    b1 = jax.random.uniform(k2, (H,), jnp.float32, -lim1, lim1)
    w2 = jax.random.uniform(k3, (H, N_OUT), jnp.float32, -lim2, lim2)
    b2 = jax.random.uniform(k4, (N_OUT,), jnp.float32, -lim2, lim2)
    return w1, b1, w2, b2


if __name__ == "__main__":
    key = jax.random.PRNGKey(0)
    k_x, k_p = jax.random.split(key)

    B = 2
    x = jax.random.normal(k_x, (B, 1, 28, 28), jnp.float32)   # NCHW, like MNIST
    w1, b1, w2, b2 = init_params(k_p)

    out = simple_mnist_forward(x, w1, b1, w2, b2)
    out = jax.block_until_ready(out)

    # Reference with the same bf16-cast / f32-accumulate math path.
    xf = x.reshape(B, K_IN).astype(jnp.bfloat16).astype(jnp.float32)
    w1f = w1.astype(jnp.bfloat16).astype(jnp.float32)
    w2f = w2.astype(jnp.bfloat16).astype(jnp.float32)
    h = jnp.maximum(xf @ w1f + b1, 0.0)
    ref = h.astype(jnp.bfloat16).astype(jnp.float32) @ w2f + b2

    assert out.shape == (B, N_OUT)
    assert jnp.allclose(out, ref, atol=1e-3, rtol=1e-3), (out, ref)

    # Also sanity-check against the pure-f32 PyTorch math (looser tol for bf16 matmuls).
    ref_f32 = jnp.maximum(x.reshape(B, K_IN) @ w1 + b1, 0.0) @ w2 + b2
    assert jnp.allclose(out, ref_f32, atol=5e-2, rtol=5e-2)

    print("KERNEL_OK")
</pallas_src>

<mosaic_0001>
module attributes {stable_mosaic.version = 11 : i64} {
  func.func @mlp_kernel(%arg0: i32, %arg1: memref<8x784xf32, #tpu.memory_space<vmem>>, %arg2: memref<784x128xbf16, #tpu.memory_space<vmem>>, %arg3: memref<1x128xf32, #tpu.memory_space<vmem>>, %arg4: memref<128x128xbf16, #tpu.memory_space<vmem>>, %arg5: memref<1x128xf32, #tpu.memory_space<vmem>>, %arg6: memref<8x128xf32, #tpu.memory_space<vmem>>) attributes {dimension_semantics = [#tpu.dimension_semantics<parallel>], iteration_bounds = array<i64: 1>, scalar_prefetch = 0 : i64, scratch_operands = 0 : i64, tpu.core_type = #tpu.core_type<tc>, window_params = [{transform_indices = @transform_0, window_bounds = array<i64: 8, 784>}, {pipeline_mode = #tpu.pipeline_mode<synchronous>, transform_indices = @transform_1, window_bounds = array<i64: 784, 128>}, {pipeline_mode = #tpu.pipeline_mode<synchronous>, transform_indices = @transform_2, window_bounds = array<i64: 1, 128>}, {pipeline_mode = #tpu.pipeline_mode<synchronous>, transform_indices = @transform_3, window_bounds = array<i64: 128, 128>}, {pipeline_mode = #tpu.pipeline_mode<synchronous>, transform_indices = @transform_4, window_bounds = array<i64: 1, 128>}, {transform_indices = @transform_5, window_bounds = array<i64: 8, 128>}]} {
    %c0 = arith.constant 0 : index
    %c0_0 = arith.constant 0 : index
    %0 = vector.load %arg1[%c0, %c0_0] : memref<8x784xf32, #tpu.memory_space<vmem>>, vector<8x784xf32>
    %1 = arith.truncf %0 : vector<8x784xf32> to vector<8x784xbf16>
    %c0_1 = arith.constant 0 : index
    %c0_2 = arith.constant 0 : index
    %2 = vector.load %arg2[%c0_1, %c0_2] : memref<784x128xbf16, #tpu.memory_space<vmem>>, vector<784x128xbf16>
    %cst = arith.constant dense<0.000000e+00> : vector<8x128xf32>
    %3 = tpu.matmul %1, %2, %cst {dimension_numbers = #tpu.dot_dimension_numbers<[1], [0], [0], [1], [0, 0, 1, 1], [], []>} : vector<8x784xbf16>, vector<784x128xbf16>, vector<8x128xf32> -> vector<8x128xf32>
    %c0_3 = arith.constant 0 : index
    %c0_4 = arith.constant 0 : index
    %4 = vector.load %arg3[%c0_3, %c0_4] : memref<1x128xf32, #tpu.memory_space<vmem>>, vector<1x128xf32>
    %5 = vector.broadcast %4 : vector<1x128xf32> to vector<8x128xf32>
    %6 = arith.addf %3, %5 : vector<8x128xf32>
    %cst_5 = arith.constant 0.000000e+00 : f32
    %7 = vector.broadcast %cst_5 : f32 to vector<8x128xf32>
    %8 = arith.maximumf %6, %7 : vector<8x128xf32>
    %9 = arith.truncf %8 : vector<8x128xf32> to vector<8x128xbf16>
    %c0_6 = arith.constant 0 : index
    %c0_7 = arith.constant 0 : index
    %10 = vector.load %arg4[%c0_6, %c0_7] : memref<128x128xbf16, #tpu.memory_space<vmem>>, vector<128x128xbf16>
    %cst_8 = arith.constant dense<0.000000e+00> : vector<8x128xf32>
    %11 = tpu.matmul %9, %10, %cst_8 {dimension_numbers = #tpu.dot_dimension_numbers<[1], [0], [0], [1], [0, 0, 1, 1], [], []>} : vector<8x128xbf16>, vector<128x128xbf16>, vector<8x128xf32> -> vector<8x128xf32>
    %c0_9 = arith.constant 0 : index
    %c0_10 = arith.constant 0 : index
    %12 = vector.load %arg5[%c0_9, %c0_10] : memref<1x128xf32, #tpu.memory_space<vmem>>, vector<1x128xf32>
    %13 = vector.broadcast %12 : vector<1x128xf32> to vector<8x128xf32>
    %14 = arith.addf %11, %13 : vector<8x128xf32>
    %c0_11 = arith.constant 0 : index
    %c0_12 = arith.constant 0 : index
    %15 = vector.load %arg6[%c0_11, %c0_12] : memref<8x128xf32, #tpu.memory_space<vmem>>, vector<8x128xf32>
    tpu.vector_store %arg6[%c0_11, %c0_12], %14 {strides = array<i32>} : memref<8x128xf32, #tpu.memory_space<vmem>>, vector<8x128xf32>,
    return
  }
  func.func @transform_0(%arg0: i32) -> (i32, i32) {
    %c0_i32 = arith.constant 0 : i32
    %c0_i32_0 = arith.constant 0 : i32
    return %arg0, %c0_i32 : i32, i32
  }
  func.func @transform_1(%arg0: i32) -> (i32, i32) {
    %c0_i32 = arith.constant 0 : i32
    %c0_i32_0 = arith.constant 0 : i32
    %c0_i32_1 = arith.constant 0 : i32
    return %c0_i32, %c0_i32_0 : i32, i32
  }
  func.func @transform_2(%arg0: i32) -> (i32, i32) {
    %c0_i32 = arith.constant 0 : i32
    %c0_i32_0 = arith.constant 0 : i32
    %c0_i32_1 = arith.constant 0 : i32
    return %c0_i32, %c0_i32_0 : i32, i32
  }
  func.func @transform_3(%arg0: i32) -> (i32, i32) {
    %c0_i32 = arith.constant 0 : i32
    %c0_i32_0 = arith.constant 0 : i32
    %c0_i32_1 = arith.constant 0 : i32
    return %c0_i32, %c0_i32_0 : i32, i32
  }
  func.func @transform_4(%arg0: i32) -> (i32, i32) {
    %c0_i32 = arith.constant 0 : i32
    %c0_i32_0 = arith.constant 0 : i32
    %c0_i32_1 = arith.constant 0 : i32
    return %c0_i32, %c0_i32_0 : i32, i32
  }
  func.func @transform_5(%arg0: i32) -> (i32, i32) {
    %c0_i32 = arith.constant 0 : i32
    %c0_i32_0 = arith.constant 0 : i32
    return %arg0, %c0_i32 : i32, i32
  }
}

</mosaic_0001>

<bundles_post_ra>
// kernel: simple_mnist_forward.1
= control target key start
LH: loop header
LB: loop body
LE: loop exit
PB: predicated region body
PF: predicated region fallthrough
CT: control target
= control target key end

     0   :  { %vm431_vm0 = vcmask 130048   ;;  %s1133_s1 = inlined_call_operand.vmem [shape: bf16[784,128], index: 1, kind: input, shape index: {}]   ;;  %s1134_s2 = inlined_call_operand.vmem [shape: f32[1,128], index: 2, kind: input, shape index: {}]   ;;  %s1135_s0 = inlined_call_operand.vmem [shape: f32[8,784], index: 0, kind: input, shape index: {}]   ;;  %s1136_s4 = inlined_call_operand.vmem [shape: f32[1,128], index: 4, kind: input, shape index: {}]   ;;  %s1137_s3 = inlined_call_operand.vmem [shape: bf16[128,128], index: 3, kind: input, shape index: {}]   ;;  %s1138_s5 = inlined_call_operand.vmem [shape: f32[8,128], index: 5, kind: output, shape index: {}]  }
   0x1   :  { %v850_v0 = vld [vmem:[%s1133_s1 + $0x38] sm:$0xff]  ;;  %v849_v3 = vld [vmem:[%s1133_s1 + $0x30] sm:$0xff]  ;;  %v848_v8 = vld [vmem:[%s1133_s1 + $0x28] sm:$0xff] }
   0x2   :  { %v858_v1 = vld [vmem:[%s1133_s1 + $0x78] sm:$0xff]  ;;  %435 = vmatpush.bf16.msra.mxu0 %v850_v0  ;;  %v857_v4 = vld [vmem:[%s1133_s1 + $0x70] sm:$0xff]  ;;  %v856_v9 = vld [vmem:[%s1133_s1 + $0x68] sm:$0xff] }
   0x3   :  { %v866_v2 = vld [vmem:[%s1133_s1 + $0xb8] sm:$0xff]  ;;  %448 = vmatpush.bf16.msra.mxu1 %v858_v1  ;;  %v865_v5 = vld [vmem:[%s1133_s1 + $0xb0] sm:$0xff]  ;;  %v864_v10 = vld [vmem:[%s1133_s1 + $0xa8] sm:$0xff] }
   0x4   :  { %461 = vmatpush.bf16.msra.mxu2 %v866_v2  ;;  %v874_v6 = vld [vmem:[%s1133_s1 + $0xf8] sm:$0xff]  ;;  %v873_v7 = vld [vmem:[%s1133_s1 + $0xf0] sm:$0xff]  ;;  %v872_v11 = vld [vmem:[%s1133_s1 + $0xe8] sm:$0xff] }
   0x5   :  { %474 = vmatpush.bf16.msra.mxu3 %v874_v6  ;;  %v847_v12 = vld [vmem:[%s1133_s1 + $0x20] sm:$0xff]  ;;  %v846_v16 = vld [vmem:[%s1133_s1 + $0x18] sm:$0xff]  ;;  %v845_v20 = vld [vmem:[%s1133_s1 + $0x10] sm:$0xff] }
   0x6   :  { %436 = vmatpush.bf16.msra.mxu0 %v849_v3  ;;  %v855_v13 = vld [vmem:[%s1133_s1 + $0x60] sm:$0xff]  ;;  %v854_v17 = vld [vmem:[%s1133_s1 + $0x58] sm:$0xff]  ;;  %v853_v21 = vld [vmem:[%s1133_s1 + $0x50] sm:$0xff] }
   0x7   :  { %449 = vmatpush.bf16.msra.mxu1 %v857_v4  ;;  %v863_v14 = vld [vmem:[%s1133_s1 + $0xa0] sm:$0xff]  ;;  %v862_v18 = vld [vmem:[%s1133_s1 + $0x98] sm:$0xff]  ;;  %v861_v22 = vld [vmem:[%s1133_s1 + $0x90] sm:$0xff] }
   0x8   :  { %462 = vmatpush.bf16.msra.mxu2 %v865_v5  ;;  %v871_v15 = vld [vmem:[%s1133_s1 + $0xe0] sm:$0xff]  ;;  %v870_v19 = vld [vmem:[%s1133_s1 + $0xd8] sm:$0xff]  ;;  %v869_v23 = vld [vmem:[%s1133_s1 + $0xd0] sm:$0xff] }
   0x9   :  { %475 = vmatpush.bf16.msra.mxu3 %v873_v7  ;;  %v844_v24 = vld [vmem:[%s1133_s1 + $0x8] sm:$0xff]  ;;  %v843_v27 = vld [vmem:[%s1133_s1] sm:$0xff]  ;;  %v882_v32 = vld [vmem:[%s1133_s1 + $0x138] sm:$0xff] }
   0xa   :  { %437 = vmatpush.bf16.msra.mxu0 %v848_v8  ;;  %v852_v25 = vld [vmem:[%s1133_s1 + $0x48] sm:$0xff]  ;;  %v851_v29 = vld [vmem:[%s1133_s1 + $0x40] sm:$0xff]  ;;  %v890_v33 = vld [vmem:[%s1133_s1 + $0x178] sm:$0xff] }
   0xb   :  { %450 = vmatpush.bf16.msra.mxu1 %v856_v9  ;;  %v860_v26 = vld [vmem:[%s1133_s1 + $0x88] sm:$0xff]  ;;  %v21_v30 = vld [vmem:[%s1135_s0] sm:$0xff]  ;;  %v23_v35 = vld [vmem:[%s1135_s0 + $0x10] sm:$0xff] }
   0xc   :  { %463 = vmatpush.bf16.msra.mxu2 %v864_v10  ;;  %v868_v28 = vld [vmem:[%s1133_s1 + $0xc8] sm:$0xff]  ;;  %v859_v34 = vld [vmem:[%s1133_s1 + $0x80] sm:$0xff]  ;;  %v28_v36 = vpack.c.bf16 %v21_v30, %v21_v30  ;;  %v24_v40 = vld [vmem:[%s1135_s0 + $0x18] sm:$0xff]  ;;  %v30_v43 = vpack.c.bf16 %v23_v35, %v23_v35 }
   0xd   :  { %476 = vmatpush.bf16.msra.mxu3 %v872_v11  ;;  %v22_v31 = vld [vmem:[%s1135_s0 + $0x8] sm:$0xff]  ;;  %v867_v38 = vld [vmem:[%s1133_s1 + $0xc0] sm:$0xff]  ;;  %v881_v41 = vld [vmem:[%s1133_s1 + $0x130] sm:$0xff]  ;;  %v31_v44 = vpack.c.bf16 %v24_v40, %v24_v40 }
   0xe   :  { %438 = vmatpush.bf16.msra.mxu0 %v847_v12  ;;  %v29_v37 = vpack.c.bf16 %v22_v31, %v22_v31  ;;  %v891_v39 = vld [vmem:[%s1133_s1 + $0x180] sm:$0xff]  ;;  %v889_v42 = vld [vmem:[%s1133_s1 + $0x170] sm:$0xff]  ;;  %v880_v45 = vld [vmem:[%s1133_s1 + $0x128] sm:$0xff] }
   0xf   :  { %451 = vmatpush.bf16.msra.mxu1 %v855_v13  ;;  %v888_v46 = vld [vmem:[%s1133_s1 + $0x168] sm:$0xff]  ;;  %v879_v47 = vld [vmem:[%s1133_s1 + $0x120] sm:$0xff]  ;;  %v878_v49 = vld [vmem:[%s1133_s1 + $0x118] sm:$0xff] }
  0x10   :  { %464 = vmatpush.bf16.msra.mxu2 %v863_v14  ;;  %v887_v48 = vld [vmem:[%s1133_s1 + $0x160] sm:$0xff]  ;;  %v886_v50 = vld [vmem:[%s1133_s1 + $0x158] sm:$0xff]  ;;  %v27_v51 = vld [vmem:[%s1135_s0 + $0x30] sm:$0xff] }
  0x11   :  { %477 = vmatpush.bf16.msra.mxu3 %v871_v15  ;;  %v877_v52 = vld [vmem:[%s1133_s1 + $0x110] sm:$0xff]  ;;  %v34_v54 = vpack.c.bf16 %v27_v51, %v27_v51  ;;  %v876_v55 = vld [vmem:[%s1133_s1 + $0x108] sm:$0xff]  ;;  %v875_v57 = vld [vmem:[%s1133_s1 + $0x100] sm:$0xff] }
  0x12   :  { %439 = vmatpush.bf16.msra.mxu0 %v846_v16  ;;  %v885_v53 = vld [vmem:[%s1133_s1 + $0x150] sm:$0xff]  ;;  %v884_v56 = vld [vmem:[%s1133_s1 + $0x148] sm:$0xff]  ;;  %v883_v58 = vld [vmem:[%s1133_s1 + $0x140] sm:$0xff] }
  0x13   :  { %452 = vmatpush.bf16.msra.mxu1 %v854_v17  ;;  %v25_v59 = vld [vmem:[%s1135_s0 + $0x20] sm:$0xff]  ;;  %v26_v60 = vld [vmem:[%s1135_s0 + $0x28] sm:$0xff]  ;;  %v899_v63 = vld [vmem:[%s1137_s3 + $0x38] sm:$0xff] }
  0x14   :  { %465 = vmatpush.bf16.msra.mxu2 %v862_v18  ;;  %v32_v61 = vpack.c.bf16 %v25_v59, %v25_v59  ;;  %v33_v62 = vpack.c.bf16 %v26_v60, %v26_v60  ;;  %v898_v0 = vld [vmem:[%s1137_s3 + $0x30] sm:$0xff]  ;;  %v897_v1 = vld [vmem:[%s1137_s3 + $0x28] sm:$0xff]  ;;  %v896_v2 = vld [vmem:[%s1137_s3 + $0x20] sm:$0xff] }
  0x15   :  { %478 = vmatpush.bf16.msra.mxu3 %v870_v19  ;;  %v895_v3 = vld [vmem:[%s1137_s3 + $0x18] sm:$0xff]  ;;  %v894_v4 = vld [vmem:[%s1137_s3 + $0x10] sm:$0xff]  ;;  %v893_v5 = vld [vmem:[%s1137_s3 + $0x8] sm:$0xff] }
  0x16   :  { %440 = vmatpush.bf16.msra.mxu0 %v845_v20  ;;  %v892_v8 = vld [vmem:[%s1137_s3] sm:$0xff] }
  0x17   :  { %453 = vmatpush.bf16.msra.mxu1 %v853_v21  ;;  %v900_v13 = vld [vmem:[%s1134_s2] ss:$0 sm:$0xff] }
  0x18   :  { %466 = vmatpush.bf16.msra.mxu2 %v861_v22  ;;  %v901_v31 = vld [vmem:[%s1136_s4] ss:$0 sm:$0xff] }
  0x19   :  { %479 = vmatpush.bf16.msra.mxu3 %v869_v23 }
  0x1a   :  { %441 = vmatpush.bf16.msra.mxu0 %v844_v24 }
  0x1b   :  { %454 = vmatpush.bf16.msra.mxu1 %v852_v25 }
  0x1c   :  { %467 = vmatpush.bf16.msra.mxu2 %v860_v26 }
  0x1d   :  { %480 = vmatpush.bf16.msra.mxu3 %v868_v28 }
  0x1e   :  { %442 = vmatpush.bf16.msra.mxu0 %v843_v27 }
  0x1f   :  { %455 = vmatpush.bf16.msra.mxu1 %v851_v29 }
  0x20   :  { %468 = vmatpush.bf16.msra.mxu2 %v859_v34 }
  0x21   :  { %443 = vmatmul.bf16.vlgmr.msra.gmra.mxu0 %v28_v36  ;;  %481 = vmatpush.bf16.msra.mxu3 %v867_v38 }
  0x22   :  { %487 = vmatpush.bf16.msrb.mxu0 %v882_v32  ;;  %456 = vmatmul.bf16.vlgmr.msra.gmra.mxu1 %v29_v37 }
  0x23   :  { %500 = vmatpush.bf16.msrb.mxu1 %v890_v33  ;;  %469 = vmatmul.bf16.vlgmr.msra.gmra.mxu2 %v30_v43 }
  0x24   :  { %520 = vmatpush.bf16.msrb.mxu2 %v891_v39  ;;  %482 = vmatmul.bf16.vlgmr.msra.gmra.mxu3 %v31_v44 }
  0x25   :  { %596 = vmatpush.bf16.msrb.mxu3 %v899_v63 }
  0x26   :  { %488 = vmatpush.bf16.msrb.mxu0 %v881_v41 }
  0x27   :  { %501 = vmatpush.bf16.msrb.mxu1 %v889_v42 }
  0x29   :  { %597 = vmatpush.bf16.msrb.mxu3 %v898_v0 }
  0x2a   :  { %489 = vmatpush.bf16.msrb.mxu0 %v880_v45 }
  0x2b   :  { %502 = vmatpush.bf16.msrb.mxu1 %v888_v46 }
  0x2d   :  { %598 = vmatpush.bf16.msrb.mxu3 %v897_v1 }
  0x2e   :  { %490 = vmatpush.bf16.msrb.mxu0 %v879_v47 }
  0x2f   :  { %503 = vmatpush.bf16.msrb.mxu1 %v887_v48 }
  0x31   :  { %599 = vmatpush.bf16.msrb.mxu3 %v896_v2 }
  0x32   :  { %491 = vmatpush.bf16.msrb.mxu0 %v878_v49 }
  0x33   :  { %504 = vmatpush.bf16.msrb.mxu1 %v886_v50  ;;  %810 = vmatmul.msk.bf16.vlgmr.msrb.gmra.mxu2 %vm431_vm0, %v34_v54 }
  0x35   :  { %600 = vmatpush.bf16.msrb.mxu3 %v895_v3 }
  0x36   :  { %492 = vmatpush.bf16.msrb.mxu0 %v877_v52 }
  0x37   :  { %505 = vmatpush.bf16.msrb.mxu1 %v885_v53 }
  0x39   :  { %601 = vmatpush.bf16.msrb.mxu3 %v894_v4 }
  0x3a   :  { %493 = vmatpush.bf16.msrb.mxu0 %v876_v55 }
  0x3b   :  { %506 = vmatpush.bf16.msrb.mxu1 %v884_v56 }
  0x3d   :  { %602 = vmatpush.bf16.msrb.mxu3 %v893_v5 }
  0x3e   :  { %494 = vmatpush.bf16.msrb.mxu0 %v875_v57 }
  0x3f   :  { %507 = vmatpush.bf16.msrb.mxu1 %v883_v58 }
  0x41   :  { %495 = vmatmul.bf16.vlgmr.msrb.gmra.mxu0 %v32_v61  ;;  %603 = vmatpush.bf16.msrb.mxu3 %v892_v8 }
  0x42   :  { %508 = vmatmul.bf16.vlgmr.msrb.gmra.mxu1 %v33_v62 }
  0x9e   :  { %v444_v6 = vpop.f32.mrf.mxu0 }
  0x9f   :  { %v457_v7 = vpop.f32.mrf.mxu1  ;;  %v445_v14 = vadd.f32 %v900_v13, %v444_v6 }
  0xa1   :  { %v458_v17 = vadd.f32 %v457_v7, %v445_v14 }
  0xa6   :  { %v446_v9 = vpop.f32.mrf.mxu0  ;;  %v470_v11 = vpop.f32.mrf.mxu2 }
  0xa7   :  { %v459_v10 = vpop.f32.mrf.mxu1  ;;  %v483_v12 = vpop.f32.mrf.mxu3  ;;  %v471_v18 = vadd.f32 %v470_v11, %v458_v17 }
  0xa9   :  { %v484_v20 = vadd.f32 %v483_v12, %v471_v18 }
  0xae   :  { %v472_v15 = vpop.f32.mrf.mxu2 }
  0xaf   :  { %v485_v16 = vpop.f32.mrf.mxu3 }
  0xb6   :  { %v522_v19 = vpop.f32.mrf.mxu2 }
  0xbe   :  { %v496_v21 = vpop.f32.mrf.mxu0  ;;  %v524_v25 = vpop.f32.mrf.mxu2 }
  0xbf   :  { %v509_v22 = vpop.f32.mrf.mxu1  ;;  %v497_v23 = vadd.f32 %v496_v21, %v484_v20 }
  0xc1   :  { %v510_v24 = vadd.f32 %v509_v22, %v497_v23 }
  0xc3   :  { %v523_v26 = vadd.f32 %v522_v19, %v510_v24 }
  0xc5   :  { %v526_v27 = vmax.f32 %v523_v26, 0.0 }
  0xc6   :  { %v498_v28 = vpop.f32.mrf.mxu0 }
  0xc7   :  { %v511_v29 = vpop.f32.mrf.mxu1  ;;  %v527_v30 = vpack.c.bf16 %v526_v27, %v526_v27 }
  0xc9   :  { %604 = vmatmul.bf16.vlgmr.msrb.gmra.mxu3 %v527_v30 }
 0x14c   :  { %v605_v32 = vpop.f32.mrf.mxu3 }
 0x14d   :  { %v606_v33 = vadd.f32 %v901_v31, %v605_v32 }
 0x14f   :  { %609 = vst [vmem:[%s1138_s5] sm:$0xff] %v606_v33 }
 0x154   :  { %v607_v34 = vpop.f32.mrf.mxu3 }

</bundles_post_ra>
